<compile_context>
chip_gen: v7x
topology: tpu7x:2x2x1
jax: 0.10.0
libtpu: 0.0.40
codegen_flags: <defaults>
</compile_context>

<pallas_src>
import jax
import jax.numpy as jnp
from jax import lax
from jax.experimental import pallas as pl
from jax.experimental.pallas import tpu as pltpu

NUM_PARAMS = 10    # number of (10, 10) parameters in the ParameterList
DIM = 10           # matrix dimension of each parameter
PAD_DIM = 16       # 10 padded up to a sublane-friendly row count
COL_ALIGN = 256    # batch padded to a multiple of the 256-wide MXU lane width


# ----------------------------------------------------------------------------
# Kernel: one lane-dense column block of x, one MXU matmul with the
# pre-multiplied weight chain.
# ----------------------------------------------------------------------------
def apply_chain_kernel(w_ref, x_ref, o_ref):
    # w_ref: (PAD_DIM, PAD_DIM) f32 -- pre-multiplied, zero-padded weight chain
    # x_ref: (PAD_DIM, TILE)    f32 -- one lane-dense column block of x
    # o_ref: (PAD_DIM, TILE)    f32
    o_ref[...] = jnp.dot(
        w_ref[...], x_ref[...],
        preferred_element_type=jnp.float32,
        precision=lax.Precision.HIGHEST,
    )


def _pick_col_tile(padded_batch):
    """Widest 256-aligned column tile, preferring >=2 blocks (v7x megacore)."""
    for tile in (1024, 512, 256):
        if padded_batch % tile == 0 and padded_batch // tile >= 2:
            return tile
    for tile in (1024, 512, 256):
        if padded_batch % tile == 0:
            return tile
    return COL_ALIGN


# ----------------------------------------------------------------------------
# Wrapper: pre-multiply the batch-independent weight chain once, then run one
# pallas_call gridded over lane-dense column blocks of x.
# ----------------------------------------------------------------------------
def mymodule_forward(params, x):
    """params: (10, 10, 10) f32 stack of the ParameterList; x: (10, B) f32."""
    n, d, _ = params.shape
    d_rows, batch = x.shape
    assert d_rows == d, (d_rows, d)

    # --- Batch-independent weight chain, computed once per call (item 1). ---
    # W_total = F_{n-1} @ ... @ F_0 with F_i = P[i//2] + P[i]; note F_0 = 2*P[0].
    # NOTE: this re-associates FP ops vs. the step-by-step reference; with
    # HIGHEST precision the relative error stays ~1e-6 over the 10-deep chain.
    w_total = params[0] + params[0]
    for i in range(1, n):
        w_total = jnp.dot(params[i // 2] + params[i], w_total,
                          precision=lax.Precision.HIGHEST)

    # --- Lean padding to TPU-friendly tiles (two pads + one slice). ---
    bp = ((batch + COL_ALIGN - 1) // COL_ALIGN) * COL_ALIGN
    tile = _pick_col_tile(bp)
    n_blocks = bp // tile

    w_pad = jnp.pad(w_total, ((0, PAD_DIM - d), (0, PAD_DIM - d)))
    x_pad = jnp.pad(x, ((0, PAD_DIM - d), (0, bp - batch)))

    flops = 2 * PAD_DIM * PAD_DIM * bp
    bytes_accessed = 4 * (w_pad.size + 2 * PAD_DIM * bp)

    out = pl.pallas_call(
        apply_chain_kernel,
        out_shape=jax.ShapeDtypeStruct((PAD_DIM, bp), jnp.float32),
        grid_spec=pl.GridSpec(
            grid=(n_blocks,),
            in_specs=[
                # Grid-invariant weight block (Pallas skips its revisit DMA).
                pl.BlockSpec((PAD_DIM, PAD_DIM), lambda j: (0, 0)),
                pl.BlockSpec((PAD_DIM, tile), lambda j: (0, j)),
            ],
            out_specs=pl.BlockSpec((PAD_DIM, tile), lambda j: (0, j)),
        ),
        compiler_params=pltpu.CompilerParams(
            dimension_semantics=("parallel",)),
        cost_estimate=pl.CostEstimate(
            flops=flops, transcendentals=0, bytes_accessed=bytes_accessed),
    )(w_pad, x_pad)

    return out[:d, :batch]


if __name__ == "__main__":
    key = jax.random.PRNGKey(0)
    kp, kx = jax.random.split(key)

    # 10 parameters of shape (10, 10), matching ParameterList([randn(10,10)]*10).
    params = jax.random.normal(kp, (NUM_PARAMS, DIM, DIM), jnp.float32)
    # x must have 10 rows for P.mm(x); use a small batch of 16 column vectors.
    x = jax.random.normal(kx, (DIM, 16), jnp.float32)

    out = jax.jit(mymodule_forward)(params, x)
    out = jax.block_until_ready(out)
    assert out.shape == (DIM, 16), out.shape

    # Pure-JAX reference of the original step-by-step loop (sanity check).
    ref = x
    for i in range(NUM_PARAMS):
        ref = (jnp.dot(params[i // 2], ref, precision="highest")
               + jnp.dot(params[i], ref, precision="highest"))
    rel_err = jnp.max(jnp.abs(out - ref)) / jnp.maximum(jnp.max(jnp.abs(ref)), 1.0)
    assert float(rel_err) < 2e-2, float(rel_err)

    print("KERNEL_OK")
</pallas_src>

<mosaic_0001>
module attributes {stable_mosaic.version = 11 : i64} {
  func.func @apply_chain_kernel(%arg0: i32, %arg1: memref<16x16xf32, #tpu.memory_space<vmem>>, %arg2: memref<16x256xf32, #tpu.memory_space<vmem>>, %arg3: memref<16x256xf32, #tpu.memory_space<vmem>>) attributes {dimension_semantics = [#tpu.dimension_semantics<parallel>], iteration_bounds = array<i64: 1>, scalar_prefetch = 0 : i64, scratch_operands = 0 : i64, tpu.core_type = #tpu.core_type<tc>, window_params = [{pipeline_mode = #tpu.pipeline_mode<synchronous>, transform_indices = @transform_0, window_bounds = array<i64: 16, 16>}, {transform_indices = @transform_1, window_bounds = array<i64: 16, 256>}, {transform_indices = @transform_2, window_bounds = array<i64: 16, 256>}]} {
    %c0 = arith.constant 0 : index
    %c0_0 = arith.constant 0 : index
    %0 = vector.load %arg1[%c0, %c0_0] : memref<16x16xf32, #tpu.memory_space<vmem>>, vector<16x16xf32>
    %c0_1 = arith.constant 0 : index
    %c0_2 = arith.constant 0 : index
    %1 = vector.load %arg2[%c0_1, %c0_2] : memref<16x256xf32, #tpu.memory_space<vmem>>, vector<16x256xf32>
    %cst = arith.constant dense<0.000000e+00> : vector<16x256xf32>
    %2 = tpu.matmul %0, %1, %cst {dimension_numbers = #tpu.dot_dimension_numbers<[1], [0], [0], [1], [0, 0, 1, 1], [], []>, precision = #tpu.contract_precision<fp32>} : vector<16x16xf32>, vector<16x256xf32>, vector<16x256xf32> -> vector<16x256xf32>
    %c0_3 = arith.constant 0 : index
    %c0_4 = arith.constant 0 : index
    %3 = vector.load %arg3[%c0_3, %c0_4] : memref<16x256xf32, #tpu.memory_space<vmem>>, vector<16x256xf32>
    tpu.vector_store %arg3[%c0_3, %c0_4], %2 {strides = array<i32>} : memref<16x256xf32, #tpu.memory_space<vmem>>, vector<16x256xf32>,
    return
  }
  func.func @transform_0(%arg0: i32) -> (i32, i32) {
    %c0_i32 = arith.constant 0 : i32
    %c0_i32_0 = arith.constant 0 : i32
    %c0_i32_1 = arith.constant 0 : i32
    return %c0_i32, %c0_i32_0 : i32, i32
  }
  func.func @transform_1(%arg0: i32) -> (i32, i32) {
    %c0_i32 = arith.constant 0 : i32
    %c0_i32_0 = arith.constant 0 : i32
    return %c0_i32, %arg0 : i32, i32
  }
  func.func @transform_2(%arg0: i32) -> (i32, i32) {
    %c0_i32 = arith.constant 0 : i32
    %c0_i32_0 = arith.constant 0 : i32
    return %c0_i32, %arg0 : i32, i32
  }
}

</mosaic_0001>

<bundles_post_ra>
// kernel: mymodule_forward.1
= control target key start
LH: loop header
LB: loop body
LE: loop exit
PB: predicated region body
PF: predicated region fallthrough
CT: control target
= control target key end

     0   :  { %vm17_vm0 = vcmask 130048   ;;  %v617_v3 = vmov 0.0   ;;  %s675_s1 = inlined_call_operand.vmem [shape: f32[16,256], index: 1, kind: input, shape index: {}]   ;;  %s676_s0 = inlined_call_operand.vmem [shape: f32[16,16], index: 0, kind: input, shape index: {}]   ;;  %s677_s2 = inlined_call_operand.vmem [shape: f32[16,256], index: 2, kind: output, shape index: {}]  }
   0x1   :  { %v14_v0 = vld [vmem:[%s675_s1 + $0x8] sm:$0xff]  ;;  %v16_v1 = vld [vmem:[%s675_s1 + $0x18] sm:$0xff]  ;;  %v13_v2 = vld [vmem:[%s675_s1] sm:$0xff]  ;;  %371 = vmatprep.mubr.f32.mxu0 %v617_v3  ;;  %92 = vmatprep.mubr.f32.mxu1 %v617_v3 }
   0x2   :  { %v24_v4 = vand.u32 4294901760, %v14_v0  ;;  %v28_v5 = vand.u32 4294901760, %v16_v1  ;;  %v15_v6 = vld [vmem:[%s675_s1 + $0x10] sm:$0xff]  ;;  %v26_v7 = vand.u32 4294901760, %v13_v2  ;;  %v11_v8 = vld [vmem:[%s676_s0] sm:$0xff]  ;;  %v12_v9 = vld [vmem:[%s676_s0 + $0x8] sm:$0xff] }
   0x3   :  { %v30_v10 = vand.u32 4294901760, %v15_v6  ;;  %v19_v11 = vsel %vm17_vm0, %v11_v8, 0  ;;  %v22_v12 = vsel %vm17_vm0, %v12_v9, 0 }
   0x4   :  { %v572_v13 = vpack.c.bf16 %v28_v5, %v24_v4  ;;  %v116_v14 = vsub.f32 %v14_v0, %v24_v4  ;;  %v128_v15 = vsub.f32 %v16_v1, %v28_v5  ;;  %v122_v16 = vsub.f32 %v13_v2, %v26_v7 }
   0x5   :  { %v574_v17 = vpack.c.bf16 %v30_v10, %v26_v7  ;;  %v134_v18 = vsub.f32 %v15_v6, %v30_v10  ;;  %v93_v19 = vand.u32 4294901760, %v19_v11  ;;  %v104_v20 = vand.u32 4294901760, %v22_v12 }
   0x6   :  { %585 = vmatprep.subr.bf16.mxu0 %v572_v13  ;;  %573 = vmatprep.subr.bf16.mxu1 %v572_v13  ;;  %v117_v21 = vand.u32 4294901760, %v116_v14  ;;  %v129_v22 = vand.u32 4294901760, %v128_v15  ;;  %v123_v23 = vand.u32 4294901760, %v122_v16  ;;  %v580_v44 = vpack.c.bf16 %v128_v15, %v116_v14 }
   0x7   :  { %587 = vmatpush1.bf16.msra.mxu0 %v574_v17  ;;  %575 = vmatpush1.bf16.msra.mxu1 %v574_v17  ;;  %v94_v24 = vsub.f32 %v19_v11, %v93_v19  ;;  %v105_v25 = vsub.f32 %v22_v12, %v104_v20  ;;  %v135_v26 = vand.u32 4294901760, %v134_v18  ;;  %v582_v46 = vpack.c.bf16 %v134_v18, %v122_v16 }
   0x8   :  { %v118_v27 = vsub.f32 %v116_v14, %v117_v21  ;;  %v130_v28 = vsub.f32 %v128_v15, %v129_v22  ;;  %v588_v29 = vpack.c.bf16 %v129_v22, %v117_v21  ;;  %v124_v30 = vsub.f32 %v122_v16, %v123_v23 }
   0x9   :  { %v95_v31 = vand.u32 4294901760, %v94_v24  ;;  %v106_v32 = vand.u32 4294901760, %v105_v25  ;;  %v136_v33 = vsub.f32 %v134_v18, %v135_v26  ;;  %v590_v34 = vpack.c.bf16 %v135_v26, %v123_v23 }
   0xa   :  { %v119_v35 = vand.u32 4294901760, %v118_v27  ;;  %v131_v36 = vand.u32 4294901760, %v130_v28  ;;  %589 = vmatprep.subr.bf16.mxu0 %v588_v29  ;;  %v125_v37 = vand.u32 4294901760, %v124_v30 }
   0xb   :  { %375 = vmatmul.mubr.f32.vlgmr.msra.gmra.mrb[0].mxu0 %v95_v31  ;;  %v96_v38 = vsub.f32 %v94_v24, %v95_v31  ;;  %v137_v39 = vand.u32 4294901760, %v136_v33  ;;  %v107_v40 = vsub.f32 %v105_v25, %v106_v32 }
   0xc   :  { %380 = vmatprep.mubr.f32.mxu0 %v617_v3  ;;  %v576_v41 = vpack.c.bf16 %v131_v36, %v119_v35  ;;  %591 = vmatpush1.bf16.msra.mxu0 %v590_v34 }
   0xd   :  { %v97_v42 = vand.u32 4294901760, %v96_v38  ;;  %v578_v43 = vpack.c.bf16 %v137_v39, %v125_v37  ;;  %593 = vmatprep.subr.bf16.mxu0 %v572_v13  ;;  %v108_v45 = vand.u32 4294901760, %v107_v40 }
   0xe   :  { %577 = vmatprep.subr.bf16.mxu1 %v576_v41 }
   0xf   :  { %98 = vmatmul.mubr.f32.vlgmr.msra.gmra.mrb[0].mxu1 %v97_v42  ;;  %384 = vmatmul.mubr.f32.gmra.mrb[2].mxu0 %v106_v32 }
  0x10   :  { %579 = vmatpush1.bf16.msra.mxu1 %v578_v43  ;;  %103 = vmatprep.mubr.f32.mxu1 %v617_v3 }
  0x11   :  { %466 = vmatprep.mubr.f32.mxu0 %v617_v3  ;;  %581 = vmatprep.subr.bf16.mxu1 %v580_v44 }
  0x13   :  { %109 = vmatmul.mubr.f32.gmra.mrb[2].mxu1 %v108_v45  ;;  %468 = vmatmul.mubr.f32.vlgmr.msra.gmra.mrb[0].mxu0 %v93_v19 }
  0x14   :  { %199 = vmatprep.mubr.f32.mxu1 %v617_v3  ;;  %473 = vmatprep.mubr.f32.mxu0 %v617_v3 }
  0x15   :  { %595 = vmatpush1.bf16.msra.mxu0 %v574_v17 }
  0x17   :  { %201 = vmatmul.mubr.f32.vlgmr.msra.gmra.mrb[0].mxu1 %v93_v19  ;;  %475 = vmatmul.mubr.f32.gmra.mrb[2].mxu0 %v104_v20 }
  0x18   :  { %583 = vmatpush1.bf16.msra.mxu1 %v582_v46  ;;  %206 = vmatprep.mubr.f32.mxu1 %v617_v3 }
  0x19   :  { %549 = vmatprep.mubr.f32.mxu0 %v617_v3 }
  0x1b   :  { %208 = vmatmul.mubr.f32.gmra.mrb[2].mxu1 %v104_v20  ;;  %551 = vmatmul.mubr.f32.vlgmr.msra.gmra.mrb[0].mxu0 %v93_v19 }
  0x1c   :  { %286 = vmatprep.mubr.f32.mxu1 %v617_v3  ;;  %556 = vmatprep.mubr.f32.mxu0 %v617_v3 }
  0x1f   :  { %289 = vmatmul.mubr.f32.vlgmr.msra.gmra.mrb[0].mxu1 %v94_v24  ;;  %558 = vmatmul.mubr.f32.gmra.mrb[2].mxu0 %v104_v20 }
  0x20   :  { %294 = vmatprep.mubr.f32.mxu1 %v617_v3 }
  0x23   :  { %297 = vmatmul.mubr.f32.gmra.mrb[2].mxu1 %v105_v25 }
  0xee   :  { %v552_v47 = vpop.f32.mrb[0].mxu0 }
  0xef   :  { %v554_v48 = vpop.f32.mrb[1].mxu0 }
  0xf2   :  { %v290_v49 = vpop.f32.mrb[0].mxu1  ;;  %v559_v50 = vpop.f32.mrb[2].mxu0 }
  0xf3   :  { %v596_v51 = vadd.f32 %v552_v47, %v290_v49  ;;  %v292_v52 = vpop.f32.mrb[1].mxu1  ;;  %v561_v53 = vpop.f32.mrb[3].mxu0 }
  0xf4   :  { %v597_v54 = vadd.f32 %v554_v48, %v292_v52 }
  0xf5   :  { %564 = vst [vmem:[%s677_s2] sm:$0xff] %v596_v51 }
  0xf6   :  { %565 = vst [vmem:[%s677_s2 + $0x8] sm:$0xff] %v597_v54  ;;  %v298_v55 = vpop.f32.mrb[2].mxu1 }
  0xf7   :  { %v598_v56 = vadd.f32 %v559_v50, %v298_v55  ;;  %v300_v57 = vpop.f32.mrb[3].mxu1 }
  0xf8   :  { %v599_v58 = vadd.f32 %v561_v53, %v300_v57 }
  0xf9   :  { %566 = vst [vmem:[%s677_s2 + $0x10] sm:$0xff] %v598_v56 }
  0xfa   :  { %567 = vst [vmem:[%s677_s2 + $0x18] sm:$0xff] %v599_v58 }

</bundles_post_ra>
